<compile_context>
chip_gen: v7x
topology: tpu7x:2x2x1
jax: 0.10.0
libtpu: 0.0.40
codegen_flags: <defaults>
</compile_context>

<pallas_src>
import functools
import math

import jax
import jax.numpy as jnp
from jax.experimental import pallas as pl
from jax.experimental.pallas import tpu as pltpu

LN_EPS = 1e-12  # RobertaConfig.layer_norm_eps default


# ------------------------------ helpers ------------------------------------

def _mxdot(a, b):
    """MXU matmul: bf16 inputs, f32 accumulation (elementwise math stays f32)."""
    return jnp.dot(a.astype(jnp.bfloat16), b.astype(jnp.bfloat16),
                   preferred_element_type=jnp.float32)


def _tile(dim, cap, aligns):
    """Largest divisor of `dim` <= cap that is a multiple of one of `aligns`
    (tried in preference order, e.g. (256,128,8) to match the v6e/v7x MXU),
    or `dim` itself if dim <= cap / nothing fits."""
    if dim <= cap:
        return dim
    for align in aligns:
        t = cap - (cap % align)
        while t >= align:
            if dim % t == 0:
                return t
            t -= align
    return dim


# ----------------------------- Pallas kernels ------------------------------

def _linear_kernel(x_ref, w_ref, b_ref, o_ref, acc_ref, *, activation):
    """Tiled y = act(x @ w + b); accumulates over the K grid axis."""
    k = pl.program_id(2)

    @pl.when(k == 0)
    def _():
        acc_ref[...] = jnp.zeros_like(acc_ref)

    acc_ref[...] += _mxdot(x_ref[...], w_ref[...])

    @pl.when(k == pl.num_programs(2) - 1)
    def _():
        y = acc_ref[...] + b_ref[...]
        if activation == "gelu":
            # TODO(synk): HF RoBERTa default is exact (erf) GELU; tanh approximation is
            # used for robust Mosaic lowering (tiny numerical difference).
            y = jax.nn.gelu(y, approximate=True)
        o_ref[...] = y.astype(o_ref.dtype)


def pallas_linear(x, w, b, activation="none"):
    """y = act(x @ w + b); x:(M,K) bf16, w:(K,N) bf16, b:(1,N) f32 -> (M,N) bf16."""
    M, K = x.shape
    N = w.shape[1]
    tm = _tile(M, 512, (8,))
    tn = _tile(N, 512, (256, 128, 8))
    tk = _tile(K, 512, (256, 128, 8))
    return pl.pallas_call(
        functools.partial(_linear_kernel, activation=activation),
        out_shape=jax.ShapeDtypeStruct((M, N), jnp.bfloat16),
        grid=(M // tm, N // tn, K // tk),
        in_specs=[
            pl.BlockSpec((tm, tk), lambda i, j, k: (i, k)),
            pl.BlockSpec((tk, tn), lambda i, j, k: (k, j)),
            pl.BlockSpec((1, tn), lambda i, j, k: (0, j)),
        ],
        out_specs=pl.BlockSpec((tm, tn), lambda i, j, k: (i, j)),
        scratch_shapes=[pltpu.VMEM((tm, tn), jnp.float32)],
        compiler_params=pltpu.CompilerParams(
            dimension_semantics=("parallel", "parallel", "arbitrary")),
    )(x, w, b)


def _linear_res_ln_kernel(x_ref, w_ref, b_ref, r_ref, g_ref, bt_ref,
                          o_ref, acc_ref, *, eps):
    """Tiled y = LayerNorm((x @ w + b) + residual); LN fused in the K epilogue."""
    k = pl.program_id(1)

    @pl.when(k == 0)
    def _():
        acc_ref[...] = jnp.zeros_like(acc_ref)

    acc_ref[...] += _mxdot(x_ref[...], w_ref[...])

    @pl.when(k == pl.num_programs(1) - 1)
    def _():
        y = acc_ref[...] + b_ref[...] + r_ref[...].astype(jnp.float32)
        mu = jnp.mean(y, axis=-1, keepdims=True)
        var = jnp.mean(jnp.square(y - mu), axis=-1, keepdims=True)
        out = (y - mu) * jax.lax.rsqrt(var + eps) * g_ref[...] + bt_ref[...]
        o_ref[...] = out.astype(o_ref.dtype)


def pallas_linear_residual_ln(x, w, b, residual, gamma, beta, eps=LN_EPS):
    """LayerNorm(x @ w + b + residual). Full N (hidden) kept per block for the LN."""
    M, K = x.shape
    N = w.shape[1]
    tm = _tile(M, 512, (8,))
    tk = _tile(K, 512, (256, 128, 8))
    return pl.pallas_call(
        functools.partial(_linear_res_ln_kernel, eps=eps),
        out_shape=jax.ShapeDtypeStruct((M, N), jnp.bfloat16),
        grid=(M // tm, K // tk),
        in_specs=[
            pl.BlockSpec((tm, tk), lambda i, k: (i, k)),
            pl.BlockSpec((tk, N), lambda i, k: (k, 0)),
            pl.BlockSpec((1, N), lambda i, k: (0, 0)),
            pl.BlockSpec((tm, N), lambda i, k: (i, 0)),
            pl.BlockSpec((1, N), lambda i, k: (0, 0)),
            pl.BlockSpec((1, N), lambda i, k: (0, 0)),
        ],
        out_specs=pl.BlockSpec((tm, N), lambda i, k: (i, 0)),
        scratch_shapes=[pltpu.VMEM((tm, N), jnp.float32)],
        compiler_params=pltpu.CompilerParams(
            dimension_semantics=("parallel", "arbitrary")),
    )(x, w, b, residual, gamma, beta)


def _emb_ln_kernel(w_ref, pos_ref, typ_ref, g_ref, b_ref, o_ref, *, eps):
    """LayerNorm(word_emb + pos_emb + type_emb) with the adds fused in-kernel."""
    x = (w_ref[...].astype(jnp.float32)
         + pos_ref[...].astype(jnp.float32)
         + typ_ref[...].astype(jnp.float32))
    mu = jnp.mean(x, axis=-1, keepdims=True)
    var = jnp.mean(jnp.square(x - mu), axis=-1, keepdims=True)
    y = (x - mu) * jax.lax.rsqrt(var + eps) * g_ref[...] + b_ref[...]
    o_ref[...] = y.astype(o_ref.dtype)


def pallas_embed_layernorm(word, pos, type_row, gamma, beta, batch, seq, eps=LN_EPS):
    """word:(B*S,H), pos:(S,H), type_row/gamma/beta:(1,H) -> LN(sum) as (B*S,H) bf16."""
    H = word.shape[1]
    return pl.pallas_call(
        functools.partial(_emb_ln_kernel, eps=eps),
        out_shape=jax.ShapeDtypeStruct((batch * seq, H), jnp.bfloat16),
        grid=(batch,),
        in_specs=[
            pl.BlockSpec((seq, H), lambda b: (b, 0)),
            pl.BlockSpec((seq, H), lambda b: (0, 0)),
            pl.BlockSpec((1, H), lambda b: (0, 0)),
            pl.BlockSpec((1, H), lambda b: (0, 0)),
            pl.BlockSpec((1, H), lambda b: (0, 0)),
        ],
        out_specs=pl.BlockSpec((seq, H), lambda b: (b, 0)),
        compiler_params=pltpu.CompilerParams(dimension_semantics=("parallel",)),
    )(word, pos, type_row, gamma, beta)


def _attention_kernel(q_ref, kv_ref, o_ref, *, num_heads, hidden):
    """Multi-head self-attention for one (batch, q-tile) grid point.

    q_ref:  (tq, 3H) bf16 block of the fused QKV activation (only Q columns used).
    kv_ref: (S, 3H)  bf16 block for the whole batch element (resident across q-tiles).
    The 1/sqrt(dh) scale is pre-folded into wq/bq, so no extra multiply here.
    Each head's context is written directly to its output lane slice (no concat).
    """
    dh = hidden // num_heads
    q_all = q_ref[...]   # (tq, 3H)
    kv = kv_ref[...]     # (S, 3H)
    for h in range(num_heads):
        q = q_all[:, h * dh:(h + 1) * dh]
        k = kv[:, hidden + h * dh: hidden + (h + 1) * dh]
        v = kv[:, 2 * hidden + h * dh: 2 * hidden + (h + 1) * dh]
        s = jax.lax.dot_general(q, k, (((1,), (1,)), ((), ())),
                                preferred_element_type=jnp.float32)
        # softmax in f32; denominator via approx reciprocal (EUP slot, VALU-free)
        s = s - jnp.max(s, axis=-1, keepdims=True)
        p = jnp.exp(s)
        p = p * pl.reciprocal(jnp.sum(p, axis=-1, keepdims=True), approx=True)
        # TODO(synk): for very long sequences, switch to an online-softmax (flash)
        # accumulator over a tiled KV axis instead of the full (tq,S) score tile.
        ctx = jnp.dot(p.astype(jnp.bfloat16), v, preferred_element_type=jnp.float32)
        o_ref[:, h * dh:(h + 1) * dh] = ctx.astype(o_ref.dtype)


def pallas_attention(qkv, batch, seq, hidden, num_heads):
    """qkv: (B*S, 3H) bf16 fused projection -> (B*S, H) bf16 attention context."""
    tq = _tile(seq, 256, (8,))
    nq = seq // tq
    return pl.pallas_call(
        functools.partial(_attention_kernel, num_heads=num_heads, hidden=hidden),
        out_shape=jax.ShapeDtypeStruct((batch * seq, hidden), jnp.bfloat16),
        grid=(batch, nq),
        in_specs=[
            # query rows for this q-tile
            pl.BlockSpec((tq, 3 * hidden), lambda b, qi: (b * nq + qi, 0)),
            # full KV block for this batch element; index_map independent of qi
            # so the block stays resident across the q-tile axis.
            pl.BlockSpec((seq, 3 * hidden), lambda b, qi: (b, 0)),
        ],
        out_specs=pl.BlockSpec((tq, hidden), lambda b, qi: (b * nq + qi, 0)),
        compiler_params=pltpu.CompilerParams(
            dimension_semantics=("parallel", "parallel")),
    )(qkv, qkv)


def _head_kernel(x_ref, w1_ref, b1_ref, w2_ref, b2_ref, o_ref, acc_ref):
    """Fused classifier head: sigmoid(tanh(x @ W1 + b1) @ W2 + b2).

    The 4096-wide intermediate is tiled along the grid axis; since tanh is
    elementwise, each chunk of the intermediate is consumed by the second
    matmul immediately and accumulated.
    """
    p = pl.program_id(0)

    @pl.when(p == 0)
    def _():
        acc_ref[...] = jnp.zeros_like(acc_ref)

    h = jnp.tanh(_mxdot(x_ref[...], w1_ref[...]) + b1_ref[...])
    acc_ref[...] += _mxdot(h, w2_ref[...])

    @pl.when(p == pl.num_programs(0) - 1)
    def _():
        o_ref[...] = jax.nn.sigmoid(acc_ref[...] + b2_ref[...])


def pallas_classifier_head(x, pre_w, pre_b, cls_w_pad, cls_b_pad, n_labels):
    """Fused pre_classifier(tanh) + classifier(sigmoid). x:(B,H) bf16.

    cls weights are pre-padded (at init) to a lane-dense multiple of 128."""
    B, H = x.shape
    P = pre_w.shape[1]          # 4096
    n_pad = cls_w_pad.shape[1]
    tp = _tile(P, 512, (256, 128, 8))
    out = pl.pallas_call(
        _head_kernel,
        out_shape=jax.ShapeDtypeStruct((B, n_pad), jnp.float32),
        grid=(P // tp,),
        in_specs=[
            pl.BlockSpec((B, H), lambda p: (0, 0)),
            pl.BlockSpec((H, tp), lambda p: (0, p)),
            pl.BlockSpec((1, tp), lambda p: (0, p)),
            pl.BlockSpec((tp, n_pad), lambda p: (p, 0)),
            pl.BlockSpec((1, n_pad), lambda p: (0, 0)),
        ],
        out_specs=pl.BlockSpec((B, n_pad), lambda p: (0, 0)),
        scratch_shapes=[pltpu.VMEM((B, n_pad), jnp.float32)],
        compiler_params=pltpu.CompilerParams(dimension_semantics=("arbitrary",)),
    )(x, pre_w, pre_b, cls_w_pad, cls_b_pad)
    return out[:, :n_labels]


# ---------------------------- parameter setup ------------------------------

def _init_linear(key, din, dout):
    kw, kb = jax.random.split(key)
    w = jax.random.normal(kw, (din, dout), jnp.float32) * 0.02
    b = jax.random.normal(kb, (dout,), jnp.float32) * 0.02
    return w, b


def init_roberta_branch(key, vocab, max_pos, hidden, n_layers, intermediate, num_heads):
    keys = jax.random.split(key, 3 + n_layers)
    p = {
        "word_emb": jax.random.normal(keys[0], (vocab, hidden), jnp.float32) * 0.02,
        "pos_emb": jax.random.normal(keys[1], (max_pos, hidden), jnp.float32) * 0.02,
        "type_emb": jax.random.normal(keys[2], (1, hidden), jnp.float32) * 0.02,
        "emb_ln_g": jnp.ones((1, hidden), jnp.float32),
        "emb_ln_b": jnp.zeros((1, hidden), jnp.float32),
        "layers": [],
    }
    scale = 1.0 / math.sqrt(hidden // num_heads)
    for l in range(n_layers):
        lk = jax.random.split(keys[3 + l], 6)
        wq, bq = _init_linear(lk[0], hidden, hidden)
        wk, bk = _init_linear(lk[1], hidden, hidden)
        wv, bv = _init_linear(lk[2], hidden, hidden)
        wo, bo = _init_linear(lk[3], hidden, hidden)
        w1, b1 = _init_linear(lk[4], hidden, intermediate)
        w2, b2 = _init_linear(lk[5], intermediate, hidden)
        p["layers"].append({
            # fused QKV projection; 1/sqrt(dh) attention scale folded into the Q part
            "wqkv": jnp.concatenate([wq * scale, wk, wv], axis=1).astype(jnp.bfloat16),
            "bqkv": jnp.concatenate([bq * scale, bk, bv], axis=0).reshape(1, 3 * hidden),
            "wo": wo.astype(jnp.bfloat16), "bo": bo.reshape(1, hidden),
            "ln1_g": jnp.ones((1, hidden), jnp.float32),
            "ln1_b": jnp.zeros((1, hidden), jnp.float32),
            "w1": w1.astype(jnp.bfloat16), "b1": b1.reshape(1, intermediate),
            "w2": w2.astype(jnp.bfloat16), "b2": b2.reshape(1, hidden),
            "ln2_g": jnp.ones((1, hidden), jnp.float32),
            "ln2_b": jnp.zeros((1, hidden), jnp.float32),
        })
    return p


def init_model(key, *, vocab, max_pos, hidden, n_layers, intermediate, n_labels,
               num_heads):
    ka, kb, kp, kc = jax.random.split(key, 4)
    pre_w, pre_b = _init_linear(kp, hidden, 4096)    # pre_classifier: Linear(hidden, 4096)
    cls_w, cls_b = _init_linear(kc, 4096, n_labels)  # classifier: Linear(4096, n_labels)
    # classifier weight/bias padded once to a lane-dense (multiple-of-128) slab
    n_pad = ((n_labels + 127) // 128) * 128
    cls_w_pad = jnp.zeros((4096, n_pad), jnp.float32).at[:, :n_labels].set(cls_w)
    cls_b_pad = jnp.zeros((1, n_pad), jnp.float32).at[:, :n_labels].set(
        cls_b.reshape(1, n_labels))
    return {
        "alpha": init_roberta_branch(ka, vocab, max_pos, hidden, n_layers,
                                     intermediate, num_heads),
        "beta": init_roberta_branch(kb, vocab, max_pos, hidden, n_layers,
                                    intermediate, num_heads),
        "pre_w": pre_w.astype(jnp.bfloat16), "pre_b": pre_b.reshape(1, 4096),
        "cls_w_pad": cls_w_pad.astype(jnp.bfloat16), "cls_b_pad": cls_b_pad,
        "n_labels": n_labels,
    }


# ------------------------------ model forward ------------------------------

def roberta_branch_forward(p, input_ids, num_heads):
    B, S = input_ids.shape
    H = p["word_emb"].shape[1]
    # RoBERTa position ids: padding_idx(=1) + 1 + position (assumes no pad tokens,
    # consistent with no attention mask being applied).
    pos_ids = jnp.arange(S, dtype=jnp.int32) + 2
    word = p["word_emb"][input_ids].reshape(B * S, H)   # plain-JAX gather
    pos = p["pos_emb"][pos_ids]                         # (S, H)
    # embeddings: (word + pos + type) add fused into the LayerNorm kernel;
    # dropout is identity at inference.
    x = pallas_embed_layernorm(word, pos, p["type_emb"],
                               p["emb_ln_g"], p["emb_ln_b"], B, S)

    for lp in p["layers"]:
        # fused Q|K|V projection (one matmul, wide N fills the MXU)
        qkv = pallas_linear(x, lp["wqkv"], lp["bqkv"])
        # multi-head self-attention, query-tiled, per-head direct output writes
        ctx = pallas_attention(qkv, B, S, H, num_heads)
        # output projection + residual + LayerNorm fused in one kernel
        x = pallas_linear_residual_ln(ctx, lp["wo"], lp["bo"], x,
                                      lp["ln1_g"], lp["ln1_b"])
        # FFN: w1 + gelu, then w2 + residual + LayerNorm fused
        h = pallas_linear(x, lp["w1"], lp["b1"], activation="gelu")
        x = pallas_linear_residual_ln(h, lp["w2"], lp["b2"], x,
                                      lp["ln2_g"], lp["ln2_b"])

    return x.reshape(B, S, H)


def roberta_branched_forward(params, input_ids_alpha, input_ids_beta, num_heads,
                             compute_unused_beta_branch=False):
    alpha_h = roberta_branch_forward(params["alpha"], input_ids_alpha, num_heads)
    # torch.cat((alpha, beta), dim=1)[:, 0, :] selects token 0 of the concatenated
    # sequence, which is alpha's token 0 -> the beta branch can never influence the
    # classifier input.  It is elided at inference (output is identical); set
    # compute_unused_beta_branch=True to mimic the reference's wasted compute.
    if compute_unused_beta_branch:
        _ = roberta_branch_forward(params["beta"], input_ids_beta, num_heads)
    encodings = alpha_h[:, 0, :]                        # (B, H) bf16
    # nn.Dropout is identity in eval/inference mode; applied as identity.
    out = pallas_classifier_head(encodings, params["pre_w"], params["pre_b"],
                                 params["cls_w_pad"], params["cls_b_pad"],
                                 params["n_labels"])
    return out


# ----------------------------------- main -----------------------------------

if __name__ == "__main__":
    # small synthetic config
    VOCAB = 50
    HIDDEN = 32
    N_LAYERS = 2
    N_HEADS = 2
    INTERMEDIATE = 64
    SEQ = 8
    BATCH = 2
    N_LABELS = 5
    MAX_POS = SEQ + 4

    key = jax.random.PRNGKey(0)
    kp, ka, kb = jax.random.split(key, 3)

    params = init_model(kp, vocab=VOCAB, max_pos=MAX_POS, hidden=HIDDEN,
                        n_layers=N_LAYERS, intermediate=INTERMEDIATE,
                        n_labels=N_LABELS, num_heads=N_HEADS)

    input_ids_alpha = jax.random.randint(ka, (BATCH, SEQ), 2, VOCAB, dtype=jnp.int32)
    input_ids_beta = jax.random.randint(kb, (BATCH, SEQ), 2, VOCAB, dtype=jnp.int32)

    out = roberta_branched_forward(params, input_ids_alpha, input_ids_beta, N_HEADS)
    out = jax.block_until_ready(out)

    assert out.shape == (BATCH, N_LABELS)
    assert bool(jnp.all((out >= 0.0) & (out <= 1.0)))
    print("KERNEL_OK")
</pallas_src>

<mosaic_0001>
module attributes {stable_mosaic.version = 11 : i64} {
  func.func @_emb_ln_kernel(%arg0: i32, %arg1: memref<8x32xf32, #tpu.memory_space<vmem>>, %arg2: memref<8x32xf32, #tpu.memory_space<vmem>>, %arg3: memref<1x32xf32, #tpu.memory_space<vmem>>, %arg4: memref<1x32xf32, #tpu.memory_space<vmem>>, %arg5: memref<1x32xf32, #tpu.memory_space<vmem>>, %arg6: memref<8x32xbf16, #tpu.memory_space<vmem>>) attributes {dimension_semantics = [#tpu.dimension_semantics<parallel>], iteration_bounds = array<i64: 2>, scalar_prefetch = 0 : i64, scratch_operands = 0 : i64, tpu.core_type = #tpu.core_type<tc>, window_params = [{transform_indices = @transform_0, window_bounds = array<i64: 8, 32>}, {pipeline_mode = #tpu.pipeline_mode<synchronous>, transform_indices = @transform_1, window_bounds = array<i64: 8, 32>}, {pipeline_mode = #tpu.pipeline_mode<synchronous>, transform_indices = @transform_2, window_bounds = array<i64: 1, 32>}, {pipeline_mode = #tpu.pipeline_mode<synchronous>, transform_indices = @transform_3, window_bounds = array<i64: 1, 32>}, {pipeline_mode = #tpu.pipeline_mode<synchronous>, transform_indices = @transform_4, window_bounds = array<i64: 1, 32>}, {transform_indices = @transform_5, window_bounds = array<i64: 8, 32>}]} {
    %c0 = arith.constant 0 : index
    %c0_0 = arith.constant 0 : index
    %0 = vector.load %arg1[%c0, %c0_0] : memref<8x32xf32, #tpu.memory_space<vmem>>, vector<8x32xf32>
    %c0_1 = arith.constant 0 : index
    %c0_2 = arith.constant 0 : index
    %1 = vector.load %arg2[%c0_1, %c0_2] : memref<8x32xf32, #tpu.memory_space<vmem>>, vector<8x32xf32>
    %2 = arith.addf %0, %1 : vector<8x32xf32>
    %c0_3 = arith.constant 0 : index
    %c0_4 = arith.constant 0 : index
    %3 = vector.load %arg3[%c0_3, %c0_4] : memref<1x32xf32, #tpu.memory_space<vmem>>, vector<1x32xf32>
    %4 = vector.broadcast %3 : vector<1x32xf32> to vector<8x32xf32>
    %5 = arith.addf %2, %4 : vector<8x32xf32>
    %cst = arith.constant dense<0.000000e+00> : vector<8xf32>
    %6 = vector.multi_reduction <add>, %5, %cst [1] : vector<8x32xf32> to vector<8xf32>
    %7 = vector.shape_cast %6 : vector<8xf32> to vector<8x1xf32>
    %cst_5 = arith.constant 3.200000e+01 : f32
    %8 = vector.broadcast %cst_5 : f32 to vector<8x1xf32>
    %9 = arith.divf %7, %8 : vector<8x1xf32>
    %10 = vector.broadcast %9 : vector<8x1xf32> to vector<8x32xf32>
    %11 = arith.subf %5, %10 : vector<8x32xf32>
    %12 = arith.mulf %11, %11 : vector<8x32xf32>
    %cst_6 = arith.constant dense<0.000000e+00> : vector<8xf32>
    %13 = vector.multi_reduction <add>, %12, %cst_6 [1] : vector<8x32xf32> to vector<8xf32>
    %14 = vector.shape_cast %13 : vector<8xf32> to vector<8x1xf32>
    %cst_7 = arith.constant 3.200000e+01 : f32
    %15 = vector.broadcast %cst_7 : f32 to vector<8x1xf32>
    %16 = arith.divf %14, %15 : vector<8x1xf32>
    %17 = vector.broadcast %9 : vector<8x1xf32> to vector<8x32xf32>
    %18 = arith.subf %5, %17 : vector<8x32xf32>
    %cst_8 = arith.constant 9.99999996E-13 : f32
    %19 = vector.broadcast %cst_8 : f32 to vector<8x1xf32>
    %20 = arith.addf %16, %19 : vector<8x1xf32>
    %21 = math.rsqrt %20 : vector<8x1xf32>
    %22 = vector.broadcast %21 : vector<8x1xf32> to vector<8x32xf32>
    %23 = arith.mulf %18, %22 : vector<8x32xf32>
    %c0_9 = arith.constant 0 : index
    %c0_10 = arith.constant 0 : index
    %24 = vector.load %arg4[%c0_9, %c0_10] : memref<1x32xf32, #tpu.memory_space<vmem>>, vector<1x32xf32>
    %25 = vector.broadcast %24 : vector<1x32xf32> to vector<8x32xf32>
    %26 = arith.mulf %23, %25 : vector<8x32xf32>
    %c0_11 = arith.constant 0 : index
    %c0_12 = arith.constant 0 : index
    %27 = vector.load %arg5[%c0_11, %c0_12] : memref<1x32xf32, #tpu.memory_space<vmem>>, vector<1x32xf32>
    %28 = vector.broadcast %27 : vector<1x32xf32> to vector<8x32xf32>
    %29 = arith.addf %26, %28 : vector<8x32xf32>
    %30 = arith.truncf %29 : vector<8x32xf32> to vector<8x32xbf16>
    %c0_13 = arith.constant 0 : index
    %c0_14 = arith.constant 0 : index
    %31 = vector.load %arg6[%c0_13, %c0_14] : memref<8x32xbf16, #tpu.memory_space<vmem>>, vector<8x32xbf16>
    tpu.vector_store %arg6[%c0_13, %c0_14], %30 {strides = array<i32>} : memref<8x32xbf16, #tpu.memory_space<vmem>>, vector<8x32xbf16>,
    return
  }
  func.func @transform_0(%arg0: i32) -> (i32, i32) {
    %c0_i32 = arith.constant 0 : i32
    %c0_i32_0 = arith.constant 0 : i32
    return %arg0, %c0_i32 : i32, i32
  }
  func.func @transform_1(%arg0: i32) -> (i32, i32) {
    %c0_i32 = arith.constant 0 : i32
    %c0_i32_0 = arith.constant 0 : i32
    %c0_i32_1 = arith.constant 0 : i32
    return %c0_i32, %c0_i32_0 : i32, i32
  }
  func.func @transform_2(%arg0: i32) -> (i32, i32) {
    %c0_i32 = arith.constant 0 : i32
    %c0_i32_0 = arith.constant 0 : i32
    %c0_i32_1 = arith.constant 0 : i32
    return %c0_i32, %c0_i32_0 : i32, i32
  }
  func.func @transform_3(%arg0: i32) -> (i32, i32) {
    %c0_i32 = arith.constant 0 : i32
    %c0_i32_0 = arith.constant 0 : i32
    %c0_i32_1 = arith.constant 0 : i32
    return %c0_i32, %c0_i32_0 : i32, i32
  }
  func.func @transform_4(%arg0: i32) -> (i32, i32) {
    %c0_i32 = arith.constant 0 : i32
    %c0_i32_0 = arith.constant 0 : i32
    %c0_i32_1 = arith.constant 0 : i32
    return %c0_i32, %c0_i32_0 : i32, i32
  }
  func.func @transform_5(%arg0: i32) -> (i32, i32) {
    %c0_i32 = arith.constant 0 : i32
    %c0_i32_0 = arith.constant 0 : i32
    return %arg0, %c0_i32 : i32, i32
  }
}

</mosaic_0001>

<bundles_post_ra>
// kernel: tpu_custom_call.1
= control target key start
LH: loop header
LB: loop body
LE: loop exit
PB: predicated region body
PF: predicated region fallthrough
CT: control target
= control target key end

     0   :  { %10 = vsyncpa [#allocation3], 0  ;;  %s842_s0 = inlined_call_operand.hbm [shape: f32[16,32], index: 0, kind: input, shape index: {}]   ;;  %s843_s1 = inlined_call_operand.hbm [shape: f32[8,32], index: 1, kind: input, shape index: {}]   ;;  %s844_s2 = inlined_call_operand.vmem [shape: f32[1,32], index: 2, kind: input, shape index: {}]   ;;  %s845_s3 = inlined_call_operand.vmem [shape: f32[1,32], index: 3, kind: input, shape index: {}]   ;;  %s846_s4 = inlined_call_operand.vmem [shape: f32[1,32], index: 4, kind: input, shape index: {}]   ;;  %s847_s5 = inlined_call_operand.hbm [shape: bf16[16,32], index: 5, kind: output, shape index: {}]  }
   0x1   :  { %12 = vsyncpa [#allocation3 + $0x1], 0 }
   0x2   :  { %13 = vsyncpa [#allocation6], 0 }
   0x3   :  { %14 = vsyncpa [#allocation4], 0 }
   0x4   :  { %16 = vsyncpa [#allocation4 + $0x1], 0  ;;  %s631_s18 = smov 0   ;;  %s633_s19 = smov 0  }
   0x5   :  { %s635_s20 = smov 0   ;;  %s637_s21 = smov 0  }
   0x6 LB: > { %s652_s22 = sadd.s32 4294967295, %s596_s21   ;;  %s392_s23 = sadd.s32 4294967294, %s596_s21   ;;  %s596_s21 = sphi %s637_s21, %s871_s21   ;;  %s592_s20 = sphi %s635_s20, %s870_s20   ;;  %s588_s19 = sphi %s633_s19, %s869_s19   ;;  %s584_s18 = sphi %s631_s18, %s868_s18  }
   0x7   : > { %p42_p0 = scmp.ne.s32.totalorder %s588_s19, %s584_s18  ;;  %p848_p1 = scmp.eq.s32.totalorder %s652_s22, 0 }
   0x8   : > { %p156_p3 = scmp.eq.s32.totalorder %s392_s23, 1  ;;  %p393_p5 = scmp.ge.s32.totalorder %s596_s21, 1 }
   0x9   : > { %p661_p4 = por %p848_p1, %p42_p0  ;;  %p163_p7 = scmp.lt.s32.totalorder %s596_s21, 3 }
   0xa   : > { %p666_p6 = por %p156_p3, %p42_p0  ;;  %s598_s27 = smov [#allocation5]  }
   0xb   : > { %s851_s24 = scalar_select %p661_p4, 1, 0 }
   0xc   : > { %s852_s25 = scalar_select %p666_p6, 1, 0 }
   0xd   : > { %p671_p8 = pnand %p393_p5, %p163_p7  ;;  %s176_s28 = sshll.u32 %s598_s27, 4  ;;  %s177_s28 = int_to_ptr.vmem [resolvable:$true] %s176_s28 }
   0xe   : > { %s679_s29 = sadd.s32 1, %s596_s21   ;;  %s29_s8 = sadd.s32 1, %s592_s20 }
   0xf   : > { %s853_s26 = scalar_select %p671_p8, 1, 0 }
  0x10   : > { %p417_p10 = pneg %p671_p8  ;;  %s26_s6 = ssub.s32 %s596_s21, %s679_s29 }
  0x11   : > { %p689_p12 = scmp.eq.s32.totalorder %s26_s6, 0  ;;  %s468_s11 = scalar_lea.hbm %s843_s1, 128 }
  0x12   : > { %p683_p11 = pnand %p417_p10, %p848_p1  ;;  %p469_p0 = scmp.ne.s32.totalorder %s843_s1, %s468_s11 }
  0x13   : > { %s855_s7 = scalar_select %p689_p12, 1, 0 }
  0x14   : > { %p470_p3 = pneg %p683_p11  ;;  %p475_p10 = scmp.lt.u32.totalorder %s468_s11, %s843_s1 }
  0x16   : > { %p471_p5 = pnand %p470_p3, %p469_p0 }
  0x18   : > { %p472_p7 = pneg %p471_p5 }
  0x1a   : > { %p477_p9 = pnand %p475_p10, %p472_p7 }
  0x1c   : > { %480 = shalt.err (!%p477_p9)
}
  0x1d   : > { %s481_s16 = scalar_lea.vmem %s177_s28, 128  ;;  %p489_p6 = scmp.lt.s32.totalorder %s177_s28, %s177_s28 }
  0x1e   : > { %p482_p1 = scmp.ne.s32.totalorder %s177_s28, %s481_s16  ;;  %p490_p4 = scmp.lt.s32.totalorder %s481_s16, %s481_s16 }
  0x20   : > { %p484_p2 = pnand %p482_p1, %p470_p3  ;;  %p491_p8 = por %p490_p4, %p489_p6 }
  0x22   : > { %p485_p13 = pneg %p484_p2 }
  0x24   : > { %p492_p12 = pnand %p491_p8, %p485_p13 }
  0x26   : > { %495 = shalt.err (!%p492_p12)
}
  0x27   : > { %420 = dma.hbm_to_vmem [thread:$0]  (!%p683_p11), %s843_s1, 128, %s177_s28, [#allocation6]  }
  0x28   : > { %p856_p1 = scmp.ne.s32.totalorder %s855_s7, 0  ;;  %p37_p2 = scmp.eq.s32.totalorder %s596_s21, 0 }
  0x29   : > { %p857_p4 = scmp.ne.s32.totalorder %s592_s20, %s588_s19  ;;  %p858_p6 = scmp.eq.s32.totalorder %s652_s22, 1 }
  0x2a   : > { %s715_s27 = scalar_select %p856_p1, %s592_s20, %s29_s8  }
  0x2b   : > { %p723_p8 = por %p858_p6, %p857_p4  ;;  %p430_p9 = scmp.lt.s32.totalorder %s596_s21, 2 }
  0x2c   : > { %s196_s6 = sand.u32 1, %s592_s20   ;;  %p860_p12 = pmov %p857_p4 }
  0x2d   : > { %s396_s9 = sshll.u32 %s196_s6, 3  ;;  %s397_s10 = sshll.u32 %s596_s21, 7 }
  0x2e   : > { %p38_p13 = por %p37_p2, %p860_p12  ;;  %s736_s28 = scalar_lea.hbm %s842_s0, %s397_s10 }
  0x2f   : > { %s200_s7 = scalar_lea.vmem [#allocation2], %s396_s9  ;;  %s197_s14 = scalar_lea.sflag [#allocation3], %s196_s6 }
  0x30   : > { %s207_s8 = sshll.u32 %s200_s7, 4  ;;  %p738_p11 = pnand %p430_p9, %p38_p13  ;;  %s742_s8 = int_to_ptr.vmem [resolvable:$true] %s207_s8 }
  0x31   : > { %s496_s15 = scalar_lea.hbm %s736_s28, 128  ;;  %s501_s23 = scalar_lea.hbm %s842_s0, 256 }
  0x32   : > { %p497_p0 = scmp.ne.s32.totalorder %s736_s28, %s496_s15  ;;  %p498_p3 = pneg %p738_p11 }
  0x33   : > { %p502_p10 = scmp.lt.u32.totalorder %s736_s28, %s842_s0  ;;  %p503_p1 = scmp.lt.u32.totalorder %s501_s23, %s496_s15 }
  0x34   : > { %p499_p5 = pnand %p498_p3, %p497_p0  ;;  %p505_p4 = scmp.lt.u32.totalorder %s496_s15, %s736_s28 }
  0x35   : > { %p504_p2 = por %p503_p1, %p502_p10 }
  0x36   : > { %p500_p7 = pneg %p499_p5 }
  0x37   : > { %p506_p6 = por %p505_p4, %p504_p2 }
  0x39   : > { %p507_p9 = pnand %p506_p6, %p500_p7 }
  0x3b   : > { %510 = shalt.err (!%p507_p9)
}
  0x3c   : > { %s511_s6 = scalar_lea.vmem %s742_s8, 128  ;;  %s599_s11 = smov [#allocation2]  }
  0x3d   : > { %p512_p12 = scmp.ne.s32.totalorder %s742_s8, %s511_s6  ;;  %s516_s12 = sshll.u32 %s599_s11, 4  ;;  %s517_s12 = int_to_ptr.vmem [resolvable:$false] %s516_s12 }
  0x3e   : > { %s518_s7 = scalar_lea.vmem %s517_s12, 256  ;;  %p519_p5 = scmp.lt.s32.totalorder %s742_s8, %s517_s12 }
  0x3f   : > { %p514_p13 = pnand %p512_p12, %p498_p3  ;;  %p520_p10 = scmp.lt.s32.totalorder %s518_s7, %s511_s6 }
  0x41   : > { %p515_p0 = pneg %p514_p13  ;;  %p521_p1 = por %p520_p10, %p519_p5 }
  0x43   : > { %p522_p2 = pnand %p521_p1, %p515_p0 }
  0x45   : > { %525 = shalt.err (!%p522_p2)
}
  0x46   : > { %424 = dma.hbm_to_vmem [thread:$0]  (!%p738_p11), %s736_s28, 128, %s742_s8, %s197_s14  }
  0x47   : > { %p862_p7 = scmp.ne.s32.totalorder %s853_s26, 0 }
  0x48   : > { %s772_s15 = sand.u32 (!%p862_p7), 1, %s588_s19   ;;  %p863_p3 = scmp.ne.s32.totalorder (!%p862_p7), %s851_s24, 0 }
  0x49   : > { %216 = sbr.rel (%p862_p7) target bundleno = 418 (0x1a2), region = 40  ;;  %s399_s16 = sshll.u32 (!%p862_p7), %s772_s15, 3 }
  0x4a   : > { %s219_s17 = scalar_lea.sflag (!%p862_p7), [#allocation3], %s772_s15  ;;  %s222_s23 = scalar_lea.vmem (!%p862_p7), [#allocation2], %s399_s16 }
  0x50   : > { %571 = dma.done.wait (%p863_p3), %s219_s17, 128  }
  0x51   : > { %573 = vsyncadd (%p863_p3), %s219_s17, 4294967168  ;;  %p864_p4 = scmp.eq.s32.totalorder %s652_s22, 0 }
  0x53   : > { %575 = dma.done.wait (%p864_p4), [#allocation6], 128   ;;  %p865_p11 = pmov %p864_p4 }
  0x54   : > { %v253_v0 = vld [vmem:[%s222_s23] sm:$0xff]  ;;  %v254_v1 = vld [vmem:[#allocation5] sm:$0xff]  ;;  %vm264_vm0 = vcmask 261120   ;;  %s401_s24 = sshll.u32 %s772_s15, 2  ;;  %s406_s10 = sshll.u32 %s652_s22, 6  ;;  %vm296_vm1 = vcmask 257024  }
  0x55   : > { %577 = vsyncadd (%p865_p11), [#allocation6], 4294967168  ;;  %v402_v2 = vld [vmem:[%s844_s2] ss:$0 sm:$0xff]  ;;  %v255_v3 = vadd.f32 %v254_v1, %v253_v0  ;;  %s252_s6 = scalar_lea.vmem [#allocation7], %s401_s24  ;;  %s798_s16 = scalar_lea.hbm %s847_s5, %s406_s10 }
  0x56   : > { %v403_v15 = vld [vmem:[%s845_s3] ss:$0 sm:$0xff]  ;;  %s312_s11 = sshll.u32 %s252_s6, 4  ;;  %s299_s17 = scalar_lea.sflag [#allocation4], %s772_s15  ;;  %s800_s11 = int_to_ptr.vmem [resolvable:$true] %s312_s11 }
  0x57   : > { %v263_v4 = vadd.f32 %v402_v2, %v255_v3  ;;  %v404_v17 = vld [vmem:[%s846_s4] ss:$0 sm:$0xff]  ;;  %s526_s23 = scalar_lea.vmem %s800_s11, 64  ;;  %s600_s22 = smov [#allocation7]  }
  0x58   : > { %p527_p6 = scmp.ne.s32.totalorder %s800_s11, %s526_s23  ;;  %s530_s26 = sshll.u32 %s600_s22, 4  ;;  %s531_s26 = int_to_ptr.vmem [resolvable:$false] %s530_s26 }
  0x59   : > { %v265_v5 = vsel %vm264_vm0, %v263_v4, 0.0  ;;  %s532_s28 = scalar_lea.vmem %s531_s26, 128  ;;  %p533_p13 = scmp.lt.s32.totalorder %s800_s11, %s531_s26 }
  0x5a   : > { %266 = vadd.xlane.f32.xlu0 %v265_v5  ;;  %p528_p9 = pnand %p527_p6, %p723_p8  ;;  %p534_p0 = scmp.lt.s32.totalorder %s532_s28, %s526_s23 }
  0x5c   : > { %p529_p12 = pneg %p528_p9  ;;  %p535_p5 = por %p534_p0, %p533_p13 }
  0x5e   : > { %p536_p10 = pnand %p535_p5, %p529_p12 }
  0xe7   : > { %v267_v6 = vpop.xlane.xlu0 %266 }
  0xe8   : > { %v269_v7 = vmul.f32 0.03125, %v267_v6 }
  0xea   : > { %v270_v8 = vsub.f32 %v263_v4, %v269_v7 }
  0xec   : > { %v271_v9 = vmul.f32 %v270_v8, %v270_v8 }
  0xee   : > { %v272_v10 = vsel %vm264_vm0, %v271_v9, 0.0 }
  0xef   : > { %273 = vadd.xlane.f32.xlu0 %v272_v10 }
 0x17c   : > { %v274_v11 = vpop.xlane.xlu0 %273 }
 0x17d   : > { %v275_v12 = vmul.f32 0.03125, %v274_v11 }
 0x17f   : > { %v276_v13 = vadd.f32 1e-12, %v275_v12 }
 0x181   : > { %466 = vrsqrt.f32 %v276_v13 }
 0x18b   : > { %v467_v14 = vpop.eup %466 }
 0x18c   : > { %v278_v16 = vmul.f32 %v467_v14, %v270_v8 }
 0x18e   : > { %v286_v18 = vmul.f32 %v403_v15, %v278_v16 }
 0x190   : > { %v294_v19 = vadd.f32 %v404_v17, %v286_v18 }
 0x192   : > { %v295_v20 = vpack.c.bf16 %v294_v19, %v294_v19 }
 0x194   : > { %297 = vst.msk [vmem:[%s252_s6] sm:$0xf] %vm296_vm1, %v295_v20 }
 0x195   : > { %539 = shalt.err (!%p536_p10)
}
 0x196   : > { %s540_s15 = scalar_lea.hbm %s798_s16, 64  ;;  %s544_s13 = scalar_lea.hbm %s847_s5, 128 }
 0x197   : > { %p541_p1 = scmp.ne.s32.totalorder %s798_s16, %s540_s15  ;;  %p545_p3 = scmp.lt.u32.totalorder %s798_s16, %s847_s5 }
 0x198   : > { %p546_p4 = scmp.lt.u32.totalorder %s544_s13, %s540_s15  ;;  %p548_p6 = scmp.lt.u32.totalorder %s540_s15, %s798_s16 }
 0x199   : > { %p542_p2 = pnand %p541_p1, %p723_p8 }
 0x19a   : > { %p547_p11 = por %p546_p4, %p545_p3 }
 0x19b   : > { %p543_p7 = pneg %p542_p2 }
 0x19c   : > { %p549_p9 = por %p548_p6, %p547_p11 }
 0x19e   : > { %p550_p12 = pnand %p549_p9, %p543_p7 }
 0x1a0   : > { %553 = shalt.err (!%p550_p12)
}
 0x1a1   : > { %415 = dma.vmem_to_hbm [thread:$0]  (%p723_p8), %s800_s11, 64, %s798_s16, %s299_s17  }
 0x1a2 PF: > { %s324_s10 = sand.u32 1, %s584_s18   ;;  %p866_p13 = scmp.ne.s32.totalorder %s852_s25, 0 }
 0x1a3   : > { %p867_p0 = scmp.ge.s32.totalorder %s596_s21, 2  ;;  %s325_s6 = scalar_lea.sflag [#allocation4], %s324_s10 }
 0x1a5   : > { %p426_p5 = pnand %p867_p0, %p866_p13 }
 0x1a7   : > { %579 = dma.done.wait (!%p426_p5), %s325_s6, 64  }
 0x1a8   : > { %581 = vsyncadd (!%p426_p5), %s325_s6, 4294967232  ;;  %p19_p10 = scmp.ge.s32.totalorder %s679_s29, 4   ;;  %s868_s18 = smov %s588_s19 }
 0x1a9   : > { %s869_s19 = smov %s592_s20  ;;  %s870_s20 = smov %s715_s27 }
 0x1aa   : > { %s871_s21 = smov %s679_s29  ;;  %21 = sbr.rel (!%p19_p10) target bundleno = 6 (0x6), region = 89 }
 0x1b1   :  { %330 = vsyncpa [#allocation3], 1 }
 0x1b2   :  { %332 = vsyncpa [#allocation3 + $0x1], 1 }
 0x1b3   :  { %333 = vsyncpa [#allocation6], 1 }
 0x1b4   :  { %334 = vsyncpa [#allocation4], 1 }
 0x1b5   :  { %336 = vsyncpa [#allocation4 + $0x1], 1 }

</bundles_post_ra>
